<compile_context>
chip_gen: v7x
topology: tpu7x:2x2x1
jax: 0.10.0
libtpu: 0.0.40
codegen_flags: <defaults>
</compile_context>

<pallas_src>
import functools

import jax
import jax.numpy as jnp
from jax import lax
from jax.experimental import pallas as pl
from jax.experimental.pallas import tpu as pltpu


def _basic_block_kernel(x_ref, w1_ref, s1_ref, t1_ref, w2_ref, s2_ref, t2_ref,
                        o_ref, xpad_ref, h1pad_ref, *, K, dilation, pad1, pad2,
                        L, NB, negative_slope):
    planes = w1_ref.shape[1]
    c_in = w1_ref.shape[2]

    s1 = s1_ref[...]
    t1 = t1_ref[...]
    s2 = s2_ref[...]
    t2 = t2_ref[...]

    # Zero only the halo columns of the padding scratches; interiors are fully
    # overwritten per sample below.  Done every grid step (tiny masked stores)
    # so the kernel stays correct when the grid is sharded across TensorCores.
    if pad1 > 0:
        zpad1 = jnp.zeros((c_in, pad1), xpad_ref.dtype)
        xpad_ref[:, :pad1] = zpad1
        xpad_ref[:, pad1 + L:] = zpad1
    if pad2 > 0:
        zpad2 = jnp.zeros((planes, pad2), h1pad_ref.dtype)
        h1pad_ref[:, :pad2] = zpad2
        h1pad_ref[:, pad2 + L:] = zpad2

    for b in range(NB):                                    # NB is small & static
        xb = x_ref[b]                                      # (C_in, L), input dtype
        xpad_ref[:, pad1:pad1 + L] = xb

        # ---- conv1 as K tap-shifted MXU matmuls, f32 accumulation ----
        acc1 = jnp.zeros((planes, L), jnp.float32)
        for k in range(K):                                 # K is small & static
            start = k * dilation
            acc1 = acc1 + jnp.dot(w1_ref[k], xpad_ref[:, start:start + L],
                                  preferred_element_type=jnp.float32)
        # bn1 (conv bias folded into shift) + act1 (LeakyReLU)
        h1 = acc1 * s1 + t1
        h1 = jnp.where(h1 >= 0, h1, negative_slope * h1)
        h1pad_ref[:, pad2:pad2 + L] = h1.astype(h1pad_ref.dtype)

        # ---- conv2 + bn2 + residual add + act2, fused epilogue ----
        acc2 = jnp.zeros((planes, L), jnp.float32)
        for k in range(K):
            start = k * dilation
            acc2 = acc2 + jnp.dot(w2_ref[k], h1pad_ref[:, start:start + L],
                                  preferred_element_type=jnp.float32)
        y = acc2 * s2 + t2 + xb.astype(jnp.float32)        # identity shortcut
        y = jnp.where(y >= 0, y, negative_slope * y)
        o_ref[b] = y.astype(o_ref.dtype)


def _pick_batch_block(N, C_in, planes, L, itemsize):
    """Pack several samples per grid step when they are small, to amortize the
    per-step pipeline overhead, while keeping double-buffered I/O tiles small."""
    budget = 4 << 20                      # ~4 MiB for pipelined in/out tiles
    best = 1
    for nb in range(1, min(N, 8) + 1):
        if N % nb != 0:
            continue
        if 2 * nb * (C_in + planes) * L * itemsize <= budget:
            best = nb
    return best


def basic_block_forward(x, params, *, ker_size, stride=1, dilation=1,
                        first_dilation=None, eps=1e-5, negative_slope=0.01):
    """Fused BasicBlock forward (inference-mode BatchNorm) as one Pallas kernel."""
    N, C_in, L = x.shape
    K = int(ker_size)
    pad1 = dilation if first_dilation is None else first_dilation
    pad2 = K // 2

    if stride != 1:
        # TODO(synk): strided conv1 + downsample path.
        raise NotImplementedError("stride > 1 (downsample path) not implemented")

    L1 = L + 2 * pad1 - dilation * (K - 1)
    L2 = L1 + 2 * pad2 - dilation * (K - 1)
    assert L1 == L and L2 == L, "padding must preserve length for the residual add"

    w1, b1 = params["w1"], params["b1"]                    # [planes, C_in, K], [planes]
    g1, be1, m1, v1 = params["gamma1"], params["beta1"], params["mean1"], params["var1"]
    w2, b2 = params["w2"], params["b2"]
    g2, be2, m2, v2 = params["gamma2"], params["beta2"], params["mean2"], params["var2"]
    planes = w1.shape[0]
    assert planes == C_in, "identity shortcut needs inplanes == planes (downsample=None)"

    # Fold conv bias + BN (running stats) into per-channel scale/shift, f32.
    s1 = (g1 / jnp.sqrt(v1 + eps)).astype(jnp.float32)
    t1 = (be1 + (b1 - m1) * s1).astype(jnp.float32)
    s2 = (g2 / jnp.sqrt(v2 + eps)).astype(jnp.float32)
    t2 = (be2 + (b2 - m2) * s2).astype(jnp.float32)
    s1 = s1.reshape(planes, 1); t1 = t1.reshape(planes, 1)
    s2 = s2.reshape(planes, 1); t2 = t2.reshape(planes, 1)

    # Weight layout for tap-wise matmul: [K, C_out, C_in]; keep MXU input dtype.
    w1_t = jnp.transpose(w1, (2, 0, 1)).astype(x.dtype)
    w2_t = jnp.transpose(w2, (2, 0, 1)).astype(x.dtype)

    NB = _pick_batch_block(N, C_in, planes, L, jnp.dtype(x.dtype).itemsize)

    kernel = functools.partial(
        _basic_block_kernel, K=K, dilation=dilation, pad1=pad1, pad2=pad2,
        L=L, NB=NB, negative_slope=negative_slope)

    out = pl.pallas_call(
        kernel,
        out_shape=jax.ShapeDtypeStruct((N, planes, L), x.dtype),
        grid_spec=pltpu.PrefetchScalarGridSpec(
            num_scalar_prefetch=0,
            grid=(N // NB,),
            in_specs=[
                pl.BlockSpec((NB, C_in, L), lambda b: (b, 0, 0)),       # x (unpadded)
                pl.BlockSpec((K, planes, C_in), lambda b: (0, 0, 0)),   # w1 taps
                pl.BlockSpec((planes, 1), lambda b: (0, 0)),            # bn1 scale
                pl.BlockSpec((planes, 1), lambda b: (0, 0)),            # bn1 shift(+bias)
                pl.BlockSpec((K, planes, planes), lambda b: (0, 0, 0)), # w2 taps
                pl.BlockSpec((planes, 1), lambda b: (0, 0)),            # bn2 scale
                pl.BlockSpec((planes, 1), lambda b: (0, 0)),            # bn2 shift(+bias)
            ],
            out_specs=pl.BlockSpec((NB, planes, L), lambda b: (b, 0, 0)),
            scratch_shapes=[
                pltpu.VMEM((C_in, L + 2 * pad1), x.dtype),    # in-kernel padded x
                pltpu.VMEM((planes, L + 2 * pad2), x.dtype),  # in-kernel padded h1
            ],
        ),
        compiler_params=pltpu.CompilerParams(
            dimension_semantics=("parallel",)),
    )(x, w1_t, s1, t1, w2_t, s2, t2)
    return out


def basic_block_reference(x, params, *, ker_size, stride=1, dilation=1,
                          first_dilation=None, eps=1e-5, negative_slope=0.01):
    """Pure-JAX reference matching the PyTorch forward (inference-mode BN)."""
    pad1 = dilation if first_dilation is None else first_dilation
    pad2 = ker_size // 2
    dn = ("NCH", "OIH", "NCH")

    def conv1d(inp, w, b, pad, strd):
        out = lax.conv_general_dilated(
            inp, w, window_strides=(strd,), padding=[(pad, pad)],
            rhs_dilation=(dilation,), dimension_numbers=dn)
        return out + b[None, :, None]

    def bn(inp, g, be, m, v):
        return ((inp - m[None, :, None]) / jnp.sqrt(v[None, :, None] + eps)
                * g[None, :, None] + be[None, :, None])

    def lrelu(inp):
        return jnp.where(inp >= 0, inp, negative_slope * inp)

    h = conv1d(x, params["w1"], params["b1"], pad1, stride)
    h = lrelu(bn(h, params["gamma1"], params["beta1"], params["mean1"], params["var1"]))
    h = conv1d(h, params["w2"], params["b2"], pad2, 1)
    h = bn(h, params["gamma2"], params["beta2"], params["mean2"], params["var2"])
    h = h + x
    return lrelu(h)


if __name__ == "__main__":
    key = jax.random.PRNGKey(0)
    N, C, L, K = 2, 4, 16, 3
    keys = jax.random.split(key, 13)
    x = jax.random.normal(keys[0], (N, C, L), dtype=jnp.float32)
    params = dict(
        w1=0.3 * jax.random.normal(keys[1], (C, C, K), dtype=jnp.float32),
        b1=0.1 * jax.random.normal(keys[2], (C,), dtype=jnp.float32),
        gamma1=1.0 + 0.1 * jax.random.normal(keys[3], (C,), dtype=jnp.float32),
        beta1=0.1 * jax.random.normal(keys[4], (C,), dtype=jnp.float32),
        mean1=0.1 * jax.random.normal(keys[5], (C,), dtype=jnp.float32),
        var1=jnp.abs(jax.random.normal(keys[6], (C,), dtype=jnp.float32)) + 0.5,
        w2=0.3 * jax.random.normal(keys[7], (C, C, K), dtype=jnp.float32),
        b2=0.1 * jax.random.normal(keys[8], (C,), dtype=jnp.float32),
        gamma2=1.0 + 0.1 * jax.random.normal(keys[9], (C,), dtype=jnp.float32),
        beta2=0.1 * jax.random.normal(keys[10], (C,), dtype=jnp.float32),
        mean2=0.1 * jax.random.normal(keys[11], (C,), dtype=jnp.float32),
        var2=jnp.abs(jax.random.normal(keys[12], (C,), dtype=jnp.float32)) + 0.5,
    )

    y = basic_block_forward(x, params, ker_size=K, stride=1, dilation=1, first_dilation=1)
    jax.block_until_ready(y)

    y_ref = basic_block_reference(x, params, ker_size=K, stride=1, dilation=1,
                                  first_dilation=1)
    assert y.shape == x.shape and y.dtype == x.dtype
    err = float(jnp.max(jnp.abs(y - y_ref)))
    assert jnp.allclose(y, y_ref, rtol=1e-4, atol=1e-4), f"max abs err = {err}"
    print("KERNEL_OK")
</pallas_src>

<mosaic_0001>
module attributes {stable_mosaic.version = 11 : i64} {
  func.func @_basic_block_kernel(%arg0: i32, %arg1: memref<2x4x16xf32, #tpu.memory_space<vmem>>, %arg2: memref<3x4x4xf32, #tpu.memory_space<vmem>>, %arg3: memref<4x1xf32, #tpu.memory_space<vmem>>, %arg4: memref<4x1xf32, #tpu.memory_space<vmem>>, %arg5: memref<3x4x4xf32, #tpu.memory_space<vmem>>, %arg6: memref<4x1xf32, #tpu.memory_space<vmem>>, %arg7: memref<4x1xf32, #tpu.memory_space<vmem>>, %arg8: memref<2x4x16xf32, #tpu.memory_space<vmem>>, %arg9: memref<4x18xf32, #tpu.memory_space<vmem>>, %arg10: memref<4x18xf32, #tpu.memory_space<vmem>>) attributes {dimension_semantics = [#tpu.dimension_semantics<parallel>], iteration_bounds = array<i64: 1>, scalar_prefetch = 0 : i64, scratch_operands = 2 : i64, tpu.core_type = #tpu.core_type<tc>, window_params = [{transform_indices = @transform_0, window_bounds = array<i64: 2, 4, 16>}, {pipeline_mode = #tpu.pipeline_mode<synchronous>, transform_indices = @transform_1, window_bounds = array<i64: 3, 4, 4>}, {pipeline_mode = #tpu.pipeline_mode<synchronous>, transform_indices = @transform_2, window_bounds = array<i64: 4, 1>}, {pipeline_mode = #tpu.pipeline_mode<synchronous>, transform_indices = @transform_3, window_bounds = array<i64: 4, 1>}, {pipeline_mode = #tpu.pipeline_mode<synchronous>, transform_indices = @transform_4, window_bounds = array<i64: 3, 4, 4>}, {pipeline_mode = #tpu.pipeline_mode<synchronous>, transform_indices = @transform_5, window_bounds = array<i64: 4, 1>}, {pipeline_mode = #tpu.pipeline_mode<synchronous>, transform_indices = @transform_6, window_bounds = array<i64: 4, 1>}, {transform_indices = @transform_7, window_bounds = array<i64: 2, 4, 16>}]} {
    %c0 = arith.constant 0 : index
    %c0_0 = arith.constant 0 : index
    %0 = vector.load %arg3[%c0, %c0_0] : memref<4x1xf32, #tpu.memory_space<vmem>>, vector<4x1xf32>
    %c0_1 = arith.constant 0 : index
    %c0_2 = arith.constant 0 : index
    %1 = vector.load %arg4[%c0_1, %c0_2] : memref<4x1xf32, #tpu.memory_space<vmem>>, vector<4x1xf32>
    %c0_3 = arith.constant 0 : index
    %c0_4 = arith.constant 0 : index
    %2 = vector.load %arg6[%c0_3, %c0_4] : memref<4x1xf32, #tpu.memory_space<vmem>>, vector<4x1xf32>
    %c0_5 = arith.constant 0 : index
    %c0_6 = arith.constant 0 : index
    %3 = vector.load %arg7[%c0_5, %c0_6] : memref<4x1xf32, #tpu.memory_space<vmem>>, vector<4x1xf32>
    %cst = arith.constant 0.000000e+00 : f32
    %4 = vector.broadcast %cst : f32 to vector<4x1xf32>
    %c0_7 = arith.constant 0 : index
    %c0_8 = arith.constant 0 : index
    %5 = vector.load %arg9[%c0_7, %c0_8] : memref<4x18xf32, #tpu.memory_space<vmem>>, vector<4x1xf32>
    tpu.vector_store %arg9[%c0_7, %c0_8], %4 {strides = array<i32>} : memref<4x18xf32, #tpu.memory_space<vmem>>, vector<4x1xf32>,
    %c0_9 = arith.constant 0 : index
    %c17 = arith.constant 17 : index
    %6 = vector.load %arg9[%c0_9, %c17] : memref<4x18xf32, #tpu.memory_space<vmem>>, vector<4x1xf32>
    tpu.vector_store %arg9[%c0_9, %c17], %4 {strides = array<i32>} : memref<4x18xf32, #tpu.memory_space<vmem>>, vector<4x1xf32>,
    %cst_10 = arith.constant 0.000000e+00 : f32
    %7 = vector.broadcast %cst_10 : f32 to vector<4x1xf32>
    %c0_11 = arith.constant 0 : index
    %c0_12 = arith.constant 0 : index
    %8 = vector.load %arg10[%c0_11, %c0_12] : memref<4x18xf32, #tpu.memory_space<vmem>>, vector<4x1xf32>
    tpu.vector_store %arg10[%c0_11, %c0_12], %7 {strides = array<i32>} : memref<4x18xf32, #tpu.memory_space<vmem>>, vector<4x1xf32>,
    %c0_13 = arith.constant 0 : index
    %c17_14 = arith.constant 17 : index
    %9 = vector.load %arg10[%c0_13, %c17_14] : memref<4x18xf32, #tpu.memory_space<vmem>>, vector<4x1xf32>
    tpu.vector_store %arg10[%c0_13, %c17_14], %7 {strides = array<i32>} : memref<4x18xf32, #tpu.memory_space<vmem>>, vector<4x1xf32>,
    %c0_15 = arith.constant 0 : index
    %c0_16 = arith.constant 0 : index
    %c0_17 = arith.constant 0 : index
    %10 = vector.load %arg1[%c0_15, %c0_16, %c0_17] : memref<2x4x16xf32, #tpu.memory_space<vmem>>, vector<1x4x16xf32>
    %11 = vector.shape_cast %10 : vector<1x4x16xf32> to vector<4x16xf32>
    %c0_18 = arith.constant 0 : index
    %c1 = arith.constant 1 : index
    %12 = vector.load %arg9[%c0_18, %c1] : memref<4x18xf32, #tpu.memory_space<vmem>>, vector<4x16xf32>
    tpu.vector_store %arg9[%c0_18, %c1], %11 {strides = array<i32>} : memref<4x18xf32, #tpu.memory_space<vmem>>, vector<4x16xf32>,
    %cst_19 = arith.constant 0.000000e+00 : f32
    %13 = vector.broadcast %cst_19 : f32 to vector<4x16xf32>
    %c0_20 = arith.constant 0 : index
    %c0_21 = arith.constant 0 : index
    %c0_22 = arith.constant 0 : index
    %14 = vector.load %arg2[%c0_20, %c0_21, %c0_22] : memref<3x4x4xf32, #tpu.memory_space<vmem>>, vector<1x4x4xf32>
    %15 = vector.shape_cast %14 : vector<1x4x4xf32> to vector<4x4xf32>
    %c0_23 = arith.constant 0 : index
    %c0_24 = arith.constant 0 : index
    %16 = vector.load %arg9[%c0_23, %c0_24] : memref<4x18xf32, #tpu.memory_space<vmem>>, vector<4x16xf32>
    %cst_25 = arith.constant dense<0.000000e+00> : vector<4x16xf32>
    %17 = tpu.matmul %15, %16, %cst_25 {dimension_numbers = #tpu.dot_dimension_numbers<[1], [0], [0], [1], [0, 0, 1, 1], [], []>} : vector<4x4xf32>, vector<4x16xf32>, vector<4x16xf32> -> vector<4x16xf32>
    %18 = arith.addf %13, %17 : vector<4x16xf32>
    %c1_26 = arith.constant 1 : index
    %c0_27 = arith.constant 0 : index
    %c0_28 = arith.constant 0 : index
    %19 = vector.load %arg2[%c1_26, %c0_27, %c0_28] : memref<3x4x4xf32, #tpu.memory_space<vmem>>, vector<1x4x4xf32>
    %20 = vector.shape_cast %19 : vector<1x4x4xf32> to vector<4x4xf32>
    %c0_29 = arith.constant 0 : index
    %c1_30 = arith.constant 1 : index
    %21 = vector.load %arg9[%c0_29, %c1_30] : memref<4x18xf32, #tpu.memory_space<vmem>>, vector<4x16xf32>
    %cst_31 = arith.constant dense<0.000000e+00> : vector<4x16xf32>
    %22 = tpu.matmul %20, %21, %cst_31 {dimension_numbers = #tpu.dot_dimension_numbers<[1], [0], [0], [1], [0, 0, 1, 1], [], []>} : vector<4x4xf32>, vector<4x16xf32>, vector<4x16xf32> -> vector<4x16xf32>
    %23 = arith.addf %18, %22 : vector<4x16xf32>
    %c2 = arith.constant 2 : index
    %c0_32 = arith.constant 0 : index
    %c0_33 = arith.constant 0 : index
    %24 = vector.load %arg2[%c2, %c0_32, %c0_33] : memref<3x4x4xf32, #tpu.memory_space<vmem>>, vector<1x4x4xf32>
    %25 = vector.shape_cast %24 : vector<1x4x4xf32> to vector<4x4xf32>
    %c0_34 = arith.constant 0 : index
    %c2_35 = arith.constant 2 : index
    %26 = vector.load %arg9[%c0_34, %c2_35] : memref<4x18xf32, #tpu.memory_space<vmem>>, vector<4x16xf32>
    %cst_36 = arith.constant dense<0.000000e+00> : vector<4x16xf32>
    %27 = tpu.matmul %25, %26, %cst_36 {dimension_numbers = #tpu.dot_dimension_numbers<[1], [0], [0], [1], [0, 0, 1, 1], [], []>} : vector<4x4xf32>, vector<4x16xf32>, vector<4x16xf32> -> vector<4x16xf32>
    %28 = arith.addf %23, %27 : vector<4x16xf32>
    %29 = vector.broadcast %0 : vector<4x1xf32> to vector<4x16xf32>
    %30 = arith.mulf %28, %29 : vector<4x16xf32>
    %31 = vector.broadcast %1 : vector<4x1xf32> to vector<4x16xf32>
    %32 = arith.addf %30, %31 : vector<4x16xf32>
    %cst_37 = arith.constant 0.000000e+00 : f32
    %33 = vector.broadcast %cst_37 : f32 to vector<4x16xf32>
    %34 = arith.cmpf oge, %32, %33 : vector<4x16xf32>
    %cst_38 = arith.constant 0.00999999977 : f32
    %35 = vector.broadcast %cst_38 : f32 to vector<4x16xf32>
    %36 = arith.mulf %35, %32 : vector<4x16xf32>
    %37 = arith.select %34, %32, %36 : vector<4x16xi1>, vector<4x16xf32>
    %c0_39 = arith.constant 0 : index
    %c1_40 = arith.constant 1 : index
    %38 = vector.load %arg10[%c0_39, %c1_40] : memref<4x18xf32, #tpu.memory_space<vmem>>, vector<4x16xf32>
    tpu.vector_store %arg10[%c0_39, %c1_40], %37 {strides = array<i32>} : memref<4x18xf32, #tpu.memory_space<vmem>>, vector<4x16xf32>,
    %cst_41 = arith.constant 0.000000e+00 : f32
    %39 = vector.broadcast %cst_41 : f32 to vector<4x16xf32>
    %c0_42 = arith.constant 0 : index
    %c0_43 = arith.constant 0 : index
    %c0_44 = arith.constant 0 : index
    %40 = vector.load %arg5[%c0_42, %c0_43, %c0_44] : memref<3x4x4xf32, #tpu.memory_space<vmem>>, vector<1x4x4xf32>
    %41 = vector.shape_cast %40 : vector<1x4x4xf32> to vector<4x4xf32>
    %c0_45 = arith.constant 0 : index
    %c0_46 = arith.constant 0 : index
    %42 = vector.load %arg10[%c0_45, %c0_46] : memref<4x18xf32, #tpu.memory_space<vmem>>, vector<4x16xf32>
    %cst_47 = arith.constant dense<0.000000e+00> : vector<4x16xf32>
    %43 = tpu.matmul %41, %42, %cst_47 {dimension_numbers = #tpu.dot_dimension_numbers<[1], [0], [0], [1], [0, 0, 1, 1], [], []>} : vector<4x4xf32>, vector<4x16xf32>, vector<4x16xf32> -> vector<4x16xf32>
    %44 = arith.addf %39, %43 : vector<4x16xf32>
    %c1_48 = arith.constant 1 : index
    %c0_49 = arith.constant 0 : index
    %c0_50 = arith.constant 0 : index
    %45 = vector.load %arg5[%c1_48, %c0_49, %c0_50] : memref<3x4x4xf32, #tpu.memory_space<vmem>>, vector<1x4x4xf32>
    %46 = vector.shape_cast %45 : vector<1x4x4xf32> to vector<4x4xf32>
    %c0_51 = arith.constant 0 : index
    %c1_52 = arith.constant 1 : index
    %47 = vector.load %arg10[%c0_51, %c1_52] : memref<4x18xf32, #tpu.memory_space<vmem>>, vector<4x16xf32>
    %cst_53 = arith.constant dense<0.000000e+00> : vector<4x16xf32>
    %48 = tpu.matmul %46, %47, %cst_53 {dimension_numbers = #tpu.dot_dimension_numbers<[1], [0], [0], [1], [0, 0, 1, 1], [], []>} : vector<4x4xf32>, vector<4x16xf32>, vector<4x16xf32> -> vector<4x16xf32>
    %49 = arith.addf %44, %48 : vector<4x16xf32>
    %c2_54 = arith.constant 2 : index
    %c0_55 = arith.constant 0 : index
    %c0_56 = arith.constant 0 : index
    %50 = vector.load %arg5[%c2_54, %c0_55, %c0_56] : memref<3x4x4xf32, #tpu.memory_space<vmem>>, vector<1x4x4xf32>
    %51 = vector.shape_cast %50 : vector<1x4x4xf32> to vector<4x4xf32>
    %c0_57 = arith.constant 0 : index
    %c2_58 = arith.constant 2 : index
    %52 = vector.load %arg10[%c0_57, %c2_58] : memref<4x18xf32, #tpu.memory_space<vmem>>, vector<4x16xf32>
    %cst_59 = arith.constant dense<0.000000e+00> : vector<4x16xf32>
    %53 = tpu.matmul %51, %52, %cst_59 {dimension_numbers = #tpu.dot_dimension_numbers<[1], [0], [0], [1], [0, 0, 1, 1], [], []>} : vector<4x4xf32>, vector<4x16xf32>, vector<4x16xf32> -> vector<4x16xf32>
    %54 = arith.addf %49, %53 : vector<4x16xf32>
    %55 = vector.broadcast %2 : vector<4x1xf32> to vector<4x16xf32>
    %56 = arith.mulf %54, %55 : vector<4x16xf32>
    %57 = vector.broadcast %3 : vector<4x1xf32> to vector<4x16xf32>
    %58 = arith.addf %56, %57 : vector<4x16xf32>
    %59 = arith.addf %58, %11 : vector<4x16xf32>
    %cst_60 = arith.constant 0.000000e+00 : f32
    %60 = vector.broadcast %cst_60 : f32 to vector<4x16xf32>
    %61 = arith.cmpf oge, %59, %60 : vector<4x16xf32>
    %cst_61 = arith.constant 0.00999999977 : f32
    %62 = vector.broadcast %cst_61 : f32 to vector<4x16xf32>
    %63 = arith.mulf %62, %59 : vector<4x16xf32>
    %64 = arith.select %61, %59, %63 : vector<4x16xi1>, vector<4x16xf32>
    %c0_62 = arith.constant 0 : index
    %c0_63 = arith.constant 0 : index
    %c0_64 = arith.constant 0 : index
    %65 = vector.load %arg8[%c0_62, %c0_63, %c0_64] : memref<2x4x16xf32, #tpu.memory_space<vmem>>, vector<1x4x16xf32>
    %66 = vector.shape_cast %65 : vector<1x4x16xf32> to vector<4x16xf32>
    %67 = vector.shape_cast %64 : vector<4x16xf32> to vector<1x4x16xf32>
    tpu.vector_store %arg8[%c0_62, %c0_63, %c0_64], %67 {strides = array<i32>} : memref<2x4x16xf32, #tpu.memory_space<vmem>>, vector<1x4x16xf32>,
    %c1_65 = arith.constant 1 : index
    %c0_66 = arith.constant 0 : index
    %c0_67 = arith.constant 0 : index
    %68 = vector.load %arg1[%c1_65, %c0_66, %c0_67] : memref<2x4x16xf32, #tpu.memory_space<vmem>>, vector<1x4x16xf32>
    %69 = vector.shape_cast %68 : vector<1x4x16xf32> to vector<4x16xf32>
    %c0_68 = arith.constant 0 : index
    %c1_69 = arith.constant 1 : index
    %70 = vector.load %arg9[%c0_68, %c1_69] : memref<4x18xf32, #tpu.memory_space<vmem>>, vector<4x16xf32>
    tpu.vector_store %arg9[%c0_68, %c1_69], %69 {strides = array<i32>} : memref<4x18xf32, #tpu.memory_space<vmem>>, vector<4x16xf32>,
    %cst_70 = arith.constant 0.000000e+00 : f32
    %71 = vector.broadcast %cst_70 : f32 to vector<4x16xf32>
    %c0_71 = arith.constant 0 : index
    %c0_72 = arith.constant 0 : index
    %c0_73 = arith.constant 0 : index
    %72 = vector.load %arg2[%c0_71, %c0_72, %c0_73] : memref<3x4x4xf32, #tpu.memory_space<vmem>>, vector<1x4x4xf32>
    %73 = vector.shape_cast %72 : vector<1x4x4xf32> to vector<4x4xf32>
    %c0_74 = arith.constant 0 : index
    %c0_75 = arith.constant 0 : index
    %74 = vector.load %arg9[%c0_74, %c0_75] : memref<4x18xf32, #tpu.memory_space<vmem>>, vector<4x16xf32>
    %cst_76 = arith.constant dense<0.000000e+00> : vector<4x16xf32>
    %75 = tpu.matmul %73, %74, %cst_76 {dimension_numbers = #tpu.dot_dimension_numbers<[1], [0], [0], [1], [0, 0, 1, 1], [], []>} : vector<4x4xf32>, vector<4x16xf32>, vector<4x16xf32> -> vector<4x16xf32>
    %76 = arith.addf %71, %75 : vector<4x16xf32>
    %c1_77 = arith.constant 1 : index
    %c0_78 = arith.constant 0 : index
    %c0_79 = arith.constant 0 : index
    %77 = vector.load %arg2[%c1_77, %c0_78, %c0_79] : memref<3x4x4xf32, #tpu.memory_space<vmem>>, vector<1x4x4xf32>
    %78 = vector.shape_cast %77 : vector<1x4x4xf32> to vector<4x4xf32>
    %c0_80 = arith.constant 0 : index
    %c1_81 = arith.constant 1 : index
    %79 = vector.load %arg9[%c0_80, %c1_81] : memref<4x18xf32, #tpu.memory_space<vmem>>, vector<4x16xf32>
    %cst_82 = arith.constant dense<0.000000e+00> : vector<4x16xf32>
    %80 = tpu.matmul %78, %79, %cst_82 {dimension_numbers = #tpu.dot_dimension_numbers<[1], [0], [0], [1], [0, 0, 1, 1], [], []>} : vector<4x4xf32>, vector<4x16xf32>, vector<4x16xf32> -> vector<4x16xf32>
    %81 = arith.addf %76, %80 : vector<4x16xf32>
    %c2_83 = arith.constant 2 : index
    %c0_84 = arith.constant 0 : index
    %c0_85 = arith.constant 0 : index
    %82 = vector.load %arg2[%c2_83, %c0_84, %c0_85] : memref<3x4x4xf32, #tpu.memory_space<vmem>>, vector<1x4x4xf32>
    %83 = vector.shape_cast %82 : vector<1x4x4xf32> to vector<4x4xf32>
    %c0_86 = arith.constant 0 : index
    %c2_87 = arith.constant 2 : index
    %84 = vector.load %arg9[%c0_86, %c2_87] : memref<4x18xf32, #tpu.memory_space<vmem>>, vector<4x16xf32>
    %cst_88 = arith.constant dense<0.000000e+00> : vector<4x16xf32>
    %85 = tpu.matmul %83, %84, %cst_88 {dimension_numbers = #tpu.dot_dimension_numbers<[1], [0], [0], [1], [0, 0, 1, 1], [], []>} : vector<4x4xf32>, vector<4x16xf32>, vector<4x16xf32> -> vector<4x16xf32>
    %86 = arith.addf %81, %85 : vector<4x16xf32>
    %87 = vector.broadcast %0 : vector<4x1xf32> to vector<4x16xf32>
    %88 = arith.mulf %86, %87 : vector<4x16xf32>
    %89 = vector.broadcast %1 : vector<4x1xf32> to vector<4x16xf32>
    %90 = arith.addf %88, %89 : vector<4x16xf32>
    %cst_89 = arith.constant 0.000000e+00 : f32
    %91 = vector.broadcast %cst_89 : f32 to vector<4x16xf32>
    %92 = arith.cmpf oge, %90, %91 : vector<4x16xf32>
    %cst_90 = arith.constant 0.00999999977 : f32
    %93 = vector.broadcast %cst_90 : f32 to vector<4x16xf32>
    %94 = arith.mulf %93, %90 : vector<4x16xf32>
    %95 = arith.select %92, %90, %94 : vector<4x16xi1>, vector<4x16xf32>
    %c0_91 = arith.constant 0 : index
    %c1_92 = arith.constant 1 : index
    %96 = vector.load %arg10[%c0_91, %c1_92] : memref<4x18xf32, #tpu.memory_space<vmem>>, vector<4x16xf32>
    tpu.vector_store %arg10[%c0_91, %c1_92], %95 {strides = array<i32>} : memref<4x18xf32, #tpu.memory_space<vmem>>, vector<4x16xf32>,
    %cst_93 = arith.constant 0.000000e+00 : f32
    %97 = vector.broadcast %cst_93 : f32 to vector<4x16xf32>
    %c0_94 = arith.constant 0 : index
    %c0_95 = arith.constant 0 : index
    %c0_96 = arith.constant 0 : index
    %98 = vector.load %arg5[%c0_94, %c0_95, %c0_96] : memref<3x4x4xf32, #tpu.memory_space<vmem>>, vector<1x4x4xf32>
    %99 = vector.shape_cast %98 : vector<1x4x4xf32> to vector<4x4xf32>
    %c0_97 = arith.constant 0 : index
    %c0_98 = arith.constant 0 : index
    %100 = vector.load %arg10[%c0_97, %c0_98] : memref<4x18xf32, #tpu.memory_space<vmem>>, vector<4x16xf32>
    %cst_99 = arith.constant dense<0.000000e+00> : vector<4x16xf32>
    %101 = tpu.matmul %99, %100, %cst_99 {dimension_numbers = #tpu.dot_dimension_numbers<[1], [0], [0], [1], [0, 0, 1, 1], [], []>} : vector<4x4xf32>, vector<4x16xf32>, vector<4x16xf32> -> vector<4x16xf32>
    %102 = arith.addf %97, %101 : vector<4x16xf32>
    %c1_100 = arith.constant 1 : index
    %c0_101 = arith.constant 0 : index
    %c0_102 = arith.constant 0 : index
    %103 = vector.load %arg5[%c1_100, %c0_101, %c0_102] : memref<3x4x4xf32, #tpu.memory_space<vmem>>, vector<1x4x4xf32>
    %104 = vector.shape_cast %103 : vector<1x4x4xf32> to vector<4x4xf32>
    %c0_103 = arith.constant 0 : index
    %c1_104 = arith.constant 1 : index
    %105 = vector.load %arg10[%c0_103, %c1_104] : memref<4x18xf32, #tpu.memory_space<vmem>>, vector<4x16xf32>
    %cst_105 = arith.constant dense<0.000000e+00> : vector<4x16xf32>
    %106 = tpu.matmul %104, %105, %cst_105 {dimension_numbers = #tpu.dot_dimension_numbers<[1], [0], [0], [1], [0, 0, 1, 1], [], []>} : vector<4x4xf32>, vector<4x16xf32>, vector<4x16xf32> -> vector<4x16xf32>
    %107 = arith.addf %102, %106 : vector<4x16xf32>
    %c2_106 = arith.constant 2 : index
    %c0_107 = arith.constant 0 : index
    %c0_108 = arith.constant 0 : index
    %108 = vector.load %arg5[%c2_106, %c0_107, %c0_108] : memref<3x4x4xf32, #tpu.memory_space<vmem>>, vector<1x4x4xf32>
    %109 = vector.shape_cast %108 : vector<1x4x4xf32> to vector<4x4xf32>
    %c0_109 = arith.constant 0 : index
    %c2_110 = arith.constant 2 : index
    %110 = vector.load %arg10[%c0_109, %c2_110] : memref<4x18xf32, #tpu.memory_space<vmem>>, vector<4x16xf32>
    %cst_111 = arith.constant dense<0.000000e+00> : vector<4x16xf32>
    %111 = tpu.matmul %109, %110, %cst_111 {dimension_numbers = #tpu.dot_dimension_numbers<[1], [0], [0], [1], [0, 0, 1, 1], [], []>} : vector<4x4xf32>, vector<4x16xf32>, vector<4x16xf32> -> vector<4x16xf32>
    %112 = arith.addf %107, %111 : vector<4x16xf32>
    %113 = vector.broadcast %2 : vector<4x1xf32> to vector<4x16xf32>
    %114 = arith.mulf %112, %113 : vector<4x16xf32>
    %115 = vector.broadcast %3 : vector<4x1xf32> to vector<4x16xf32>
    %116 = arith.addf %114, %115 : vector<4x16xf32>
    %117 = arith.addf %116, %69 : vector<4x16xf32>
    %cst_112 = arith.constant 0.000000e+00 : f32
    %118 = vector.broadcast %cst_112 : f32 to vector<4x16xf32>
    %119 = arith.cmpf oge, %117, %118 : vector<4x16xf32>
    %cst_113 = arith.constant 0.00999999977 : f32
    %120 = vector.broadcast %cst_113 : f32 to vector<4x16xf32>
    %121 = arith.mulf %120, %117 : vector<4x16xf32>
    %122 = arith.select %119, %117, %121 : vector<4x16xi1>, vector<4x16xf32>
    %c1_114 = arith.constant 1 : index
    %c0_115 = arith.constant 0 : index
    %c0_116 = arith.constant 0 : index
    %123 = vector.load %arg8[%c1_114, %c0_115, %c0_116] : memref<2x4x16xf32, #tpu.memory_space<vmem>>, vector<1x4x16xf32>
    %124 = vector.shape_cast %123 : vector<1x4x16xf32> to vector<4x16xf32>
    %125 = vector.shape_cast %122 : vector<4x16xf32> to vector<1x4x16xf32>
    tpu.vector_store %arg8[%c1_114, %c0_115, %c0_116], %125 {strides = array<i32>} : memref<2x4x16xf32, #tpu.memory_space<vmem>>, vector<1x4x16xf32>,
    return
  }
  func.func @transform_0(%arg0: i32) -> (i32, i32, i32) {
    %c0_i32 = arith.constant 0 : i32
    %c0_i32_0 = arith.constant 0 : i32
    %c0_i32_1 = arith.constant 0 : i32
    return %arg0, %c0_i32, %c0_i32_0 : i32, i32, i32
  }
  func.func @transform_1(%arg0: i32) -> (i32, i32, i32) {
    %c0_i32 = arith.constant 0 : i32
    %c0_i32_0 = arith.constant 0 : i32
    %c0_i32_1 = arith.constant 0 : i32
    %c0_i32_2 = arith.constant 0 : i32
    return %c0_i32, %c0_i32_0, %c0_i32_1 : i32, i32, i32
  }
  func.func @transform_2(%arg0: i32) -> (i32, i32) {
    %c0_i32 = arith.constant 0 : i32
    %c0_i32_0 = arith.constant 0 : i32
    %c0_i32_1 = arith.constant 0 : i32
    return %c0_i32, %c0_i32_0 : i32, i32
  }
  func.func @transform_3(%arg0: i32) -> (i32, i32) {
    %c0_i32 = arith.constant 0 : i32
    %c0_i32_0 = arith.constant 0 : i32
    %c0_i32_1 = arith.constant 0 : i32
    return %c0_i32, %c0_i32_0 : i32, i32
  }
  func.func @transform_4(%arg0: i32) -> (i32, i32, i32) {
    %c0_i32 = arith.constant 0 : i32
    %c0_i32_0 = arith.constant 0 : i32
    %c0_i32_1 = arith.constant 0 : i32
    %c0_i32_2 = arith.constant 0 : i32
    return %c0_i32, %c0_i32_0, %c0_i32_1 : i32, i32, i32
  }
  func.func @transform_5(%arg0: i32) -> (i32, i32) {
    %c0_i32 = arith.constant 0 : i32
    %c0_i32_0 = arith.constant 0 : i32
    %c0_i32_1 = arith.constant 0 : i32
    return %c0_i32, %c0_i32_0 : i32, i32
  }
  func.func @transform_6(%arg0: i32) -> (i32, i32) {
    %c0_i32 = arith.constant 0 : i32
    %c0_i32_0 = arith.constant 0 : i32
    %c0_i32_1 = arith.constant 0 : i32
    return %c0_i32, %c0_i32_0 : i32, i32
  }
  func.func @transform_7(%arg0: i32) -> (i32, i32, i32) {
    %c0_i32 = arith.constant 0 : i32
    %c0_i32_0 = arith.constant 0 : i32
    %c0_i32_1 = arith.constant 0 : i32
    return %arg0, %c0_i32, %c0_i32_0 : i32, i32, i32
  }
}

</mosaic_0001>

<bundles_post_ra>
// kernel: tpu_custom_call.1
= control target key start
LH: loop header
LB: loop body
LE: loop exit
PB: predicated region body
PF: predicated region fallthrough
CT: control target
= control target key end

     0   :  { %12 = vsyncpa [#allocation5], 0  ;;  %s1492_s0 = inlined_call_operand.hbm [shape: f32[2,4,16], index: 0, kind: input, shape index: {}]   ;;  %s1493_s1 = inlined_call_operand.vmem [shape: f32[3,4,4], index: 1, kind: input, shape index: {}]   ;;  %s1494_s2 = inlined_call_operand.vmem [shape: f32[4,1], index: 2, kind: input, shape index: {}]   ;;  %s1495_s3 = inlined_call_operand.vmem [shape: f32[4,1], index: 3, kind: input, shape index: {}]   ;;  %s1496_s4 = inlined_call_operand.vmem [shape: f32[3,4,4], index: 4, kind: input, shape index: {}]   ;;  %s1497_s5 = inlined_call_operand.vmem [shape: f32[4,1], index: 5, kind: input, shape index: {}]   ;;  %s1498_s6 = inlined_call_operand.vmem [shape: f32[4,1], index: 6, kind: input, shape index: {}]   ;;  %s1499_s7 = inlined_call_operand.hbm [shape: f32[2,4,16], index: 7, kind: output, shape index: {}]  }
   0x1   :  { %13 = vsyncpa [#allocation6], 0  ;;  %s1276_s24 = smov [#allocation4]   ;;  %s1228_s28 = scalar_lea.hbm %s1492_s0, 128 }
   0x2   :  { %s19_s25 = sshll.u32 %s1276_s24, 4  ;;  %p1229_p0 = scmp.ne.s32.totalorder %s1492_s0, %s1228_s28  ;;  %s20_s25 = int_to_ptr.vmem [resolvable:$true] %s19_s25 }
   0x3   :  { %p1232_p1 = scmp.lt.u32.totalorder %s1228_s28, %s1492_s0 }
   0x5   :  { %p1234_p2 = pnand %p1232_p1, %p1229_p0 }
   0x7   :  { %1237 = shalt.err (!%p1234_p2)
}
   0x8   :  { %s1238_s10 = scalar_lea.vmem %s20_s25, 128  ;;  %p1243_p4 = scmp.lt.s32.totalorder %s20_s25, %s20_s25 }
   0x9   :  { %p1239_p3 = scmp.ne.s32.totalorder %s20_s25, %s1238_s10  ;;  %p1244_p5 = scmp.lt.s32.totalorder %s1238_s10, %s1238_s10 }
   0xb   :  { %p1245_p6 = por %p1244_p5, %p1243_p4 }
   0xd   :  { %p1246_p7 = pnand %p1245_p6, %p1239_p3 }
   0xf   :  { %1249 = shalt.err (!%p1246_p7)
}
  0x10   :  { %s1277_s11 = smov 64   ;;  %s1278_s12 = smov 4  }
  0x11   :  { %25 = dma.hbm_to_vmem [thread:$0]  %s1492_s0, 128, %s20_s25, [#allocation5], %s1277_s11, %s1277_s11, %s1278_s12  }
  0x12   :  { %1272 = dma.done.wait [#allocation5], 128  }
  0x13   :  { %1273 = vsyncadd [#allocation5], 4294967168  ;;  %vm45_vm0 = vcmask 3072   ;;  %vm47_vm1 = vcmask 142472   ;;  %v1279_v0 = vmov 0.0   ;;  %s1280_s0 = smov 1  }
  0x14   :  { %46 = vst.msk [vmem:[#allocation2] sm:$0xf] %vm45_vm0, %v1279_v0  ;;  %49 = vst.msk [vmem:[#allocation3] sm:$0xf] %vm45_vm0, %v1279_v0  ;;  %1140 = vmatprep.subr.mxu0 %v1279_v0  ;;  %1155 = vmatprep.subr.mxu1 %v1279_v0  ;;  %v1347_v1 = vld [vmem:[#allocation4] sm:$0xf] }
  0x15   :  { %48 = vst.msk [vmem:[#allocation2] sm:$0xf] %vm47_vm1, %v1279_v0  ;;  %50 = vst.msk [vmem:[#allocation3] sm:$0xf] %vm47_vm1, %v1279_v0  ;;  %53 = vrot.lane.b32.xlu0 %v1347_v1, %s1280_s0  ;;  %v1351_v2 = vld [vmem:[#allocation4 + $0x4] sm:$0xf] }
  0x16   :  { %vm1281_vm2 = vmmov 0   ;;  %vm56_vm3 = vcmask 134152   ;;  %s1282_s15 = smov 127   ;;  %s1283_s16 = smov 126   ;;  %v41_v7 = vld [vmem:[%s1494_s2] sm:$0xf] }
  0x17   :  { %1142 = vmatprep.mubr.msk.f32.mxu0 %vm1281_vm2, %v1279_v0  ;;  %1157 = vmatprep.mubr.msk.f32.mxu1 %vm1281_vm2, %v1279_v0  ;;  %v42_v8 = vld [vmem:[%s1495_s3] sm:$0xf]  ;;  %v1284_v9 = vmov 0   ;;  %vm69_vm4 = vcmask 1043456   ;;  %v1084_v10 = vld [vmem:[%s1493_s1 + $0x4] sm:$0xf] }
  0x18   :  { %1226 = vset.pattern.permute.xlu0 %v1284_v9  ;;  %1227 = vset.pattern.permute.xlu1 %v1284_v9  ;;  %vm65_vm5 = vcmask 31744   ;;  %v58_v12 = vld [vmem:[%s1493_s1] sm:$0xf]  ;;  %v1089_v14 = vld [vmem:[%s1493_s1 + $0x8] sm:$0xf]  ;;  %vm570_vm9 = vcmask 125952  }
  0x19   :  { %575 = vrot.lane.b32.xlu0 %v1351_v2, %s1280_s0  ;;  %v1100_v16 = vld [vmem:[%s1493_s1 + $0x4] sm:$0xf]  ;;  %v579_v17 = vld [vmem:[%s1493_s1] sm:$0xf]  ;;  %v1105_v19 = vld [vmem:[%s1493_s1 + $0x8] sm:$0xf] }
  0x1a   :  { %v44_v38 = vld [vmem:[%s1498_s6] sm:$0xf]  ;;  %v1092_v40 = vld [vmem:[%s1496_s4 + $0x4] sm:$0xf]  ;;  %v1097_v44 = vld [vmem:[%s1496_s4 + $0x8] sm:$0xf] }
  0x1b   :  { %v43_v39 = vld [vmem:[%s1497_s5] sm:$0xf]  ;;  %v1108_v45 = vld [vmem:[%s1496_s4 + $0x4] sm:$0xf]  ;;  %v1113_v49 = vld [vmem:[%s1496_s4 + $0x8] sm:$0xf] }
  0x1c   :  { %v317_v42 = vld [vmem:[%s1496_s4] sm:$0xf] }
  0x1d   :  { %v824_v47 = vld [vmem:[%s1496_s4] sm:$0xf]  ;;  %s1285_s4 = smov [#allocation7]  }
  0x1e   :  { %s1072_s22 = sshll.u32 %s1285_s4, 4  ;;  %s1073_s22 = int_to_ptr.vmem [resolvable:$true] %s1072_s22 }
  0x1f   :  { %s1250_s2 = scalar_lea.vmem %s1073_s22, 128  ;;  %p1255_p9 = scmp.lt.s32.totalorder %s1073_s22, %s1073_s22 }
  0x20   :  { %p1251_p8 = scmp.ne.s32.totalorder %s1073_s22, %s1250_s2  ;;  %p1256_p10 = scmp.lt.s32.totalorder %s1250_s2, %s1250_s2 }
  0x22   :  { %p1257_p11 = por %p1256_p10, %p1255_p9 }
  0x24   :  { %p1258_p12 = pnand %p1257_p11, %p1251_p8 }
  0x87   :  { %v54_v3 = vpop.permute.xlu0 %53 }
  0x88   :  { %57 = vst.msk [vmem:[#allocation2] sm:$0xf] %vm56_vm3, %v54_v3 }
  0x8b   :  { %v576_v4 = vpop.permute.xlu0 %575 }
  0x8f   :  { %v59_v5 = vld [vmem:[#allocation2] sm:$0xf] }
  0x90   :  { %63 = vrot.lane.b32.xlu1 %v59_v5, %s1282_s15  ;;  %578 = vst.msk [vmem:[#allocation2] sm:$0xf] %vm56_vm3, %v576_v4 }
  0x94   :  { %219 = vrot.lane.b32.xlu1 %v59_v5, %s1283_s16 }
  0x97   :  { %v580_v6 = vld [vmem:[#allocation2] sm:$0xf] }
  0x98   :  { %583 = vrot.lane.b32.xlu0 %v580_v6, %s1282_s15  ;;  %736 = vrot.lane.b32.xlu1 %v580_v6, %s1283_s16 }
  0x9c   :  { %299 = vperm.xlu0 %1226, %v41_v7   ;;  %305 = vperm.xlu1 %1227, %v42_v8  }
 0x102   :  { %v64_v11 = vpop.permute.xlu1 %63 }
 0x103   :  { %1141 = vmatpush3.msk.msra.mxu0 %vm69_vm4, %v64_v11 }
 0x104   :  { %1143 = vmatmul.mubr.msk.f32.vlgmr.msra.gmra.mrb[0].mxu0 %vm65_vm5, %v1084_v10  ;;  %1145 = vmatprep.subr.mxu0 %v1279_v0 }
 0x105   :  { %1146 = vmatpush3.msk.msra.mxu0 %vm69_vm4, %v59_v5  ;;  %1147 = vmatprep.mubr.msk.f32.mxu0 %vm1281_vm2, %v1279_v0 }
 0x106   :  { %1150 = vmatprep.subr.mxu0 %v1279_v0  ;;  %v220_v13 = vpop.permute.xlu1 %219 }
 0x10a   :  { %v584_v15 = vpop.permute.xlu0 %583  ;;  %v737_v18 = vpop.permute.xlu1 %736 }
 0x10c   :  { %1148 = vmatmul.mubr.msk.f32.vlgmr.msra.gmra.mrb[0].mxu0 %vm65_vm5, %v58_v12 }
 0x10d   :  { %1151 = vmatpush3.msk.msra.mxu0 %vm69_vm4, %v220_v13  ;;  %1152 = vmatprep.mubr.msk.f32.mxu0 %vm1281_vm2, %v1279_v0 }
 0x10e   :  { %1170 = vmatprep.subr.mxu0 %v1279_v0 }
 0x114   :  { %1153 = vmatmul.mubr.msk.f32.vlgmr.msra.gmra.mrb[0].mxu0 %vm65_vm5, %v1089_v14 }
 0x115   :  { %1171 = vmatpush3.msk.msra.mxu0 %vm69_vm4, %v584_v15  ;;  %1172 = vmatprep.mubr.msk.f32.mxu0 %vm1281_vm2, %v1279_v0 }
 0x116   :  { %1175 = vmatprep.subr.mxu0 %v1279_v0 }
 0x118   :  { %1173 = vmatmul.mubr.msk.f32.vlgmr.msra.gmra.mrb[2].mxu0 %vm65_vm5, %v1100_v16 }
 0x119   :  { %1176 = vmatpush3.msk.msra.mxu0 %vm69_vm4, %v580_v6  ;;  %1177 = vmatprep.mubr.msk.f32.mxu0 %vm1281_vm2, %v1279_v0 }
 0x11a   :  { %1180 = vmatprep.subr.mxu0 %v1279_v0 }
 0x11b   :  { %v300_v20 = vpop.permute.xlu0 %299  ;;  %v306_v22 = vpop.permute.xlu1 %305 }
 0x120   :  { %1178 = vmatmul.mubr.msk.f32.vlgmr.msra.gmra.mrb[2].mxu0 %vm65_vm5, %v579_v17 }
 0x121   :  { %1181 = vmatpush3.msk.msra.mxu0 %vm69_vm4, %v737_v18  ;;  %1182 = vmatprep.mubr.msk.f32.mxu0 %vm1281_vm2, %v1279_v0 }
 0x128   :  { %1183 = vmatmul.mubr.msk.f32.vlgmr.msra.gmra.mrb[2].mxu0 %vm65_vm5, %v1105_v19 }
 0x1e7   :  { %v292_v21 = vpop.f32.mrb[0].mxu0 }
 0x1e8   :  { %v302_v23 = vmul.f32 %v300_v20, %v292_v21  ;;  %v1154_v24 = vpop.f32.mrb[1].mxu0 }
 0x1ea   :  { %v308_v25 = vadd.f32 %v306_v22, %v302_v23 }
 0x1ec   :  { %vm309_vm6 = vcmp.ge.f32.partialorder %v308_v25, 0.0  ;;  %v310_v26 = vmul.f32 0.01, %v308_v25 }
 0x1ee   :  { %v311_v27 = vsel %vm309_vm6, %v308_v25, %v310_v26 }
 0x1ef   :  { %313 = vrot.lane.b32.xlu1 %v311_v27, %s1280_s0 }
 0x1fb   :  { %v809_v28 = vpop.f32.mrb[2].mxu0 }
 0x1fc   :  { %v814_v29 = vmul.f32 %v809_v28, %v300_v20  ;;  %v1184_v30 = vpop.f32.mrb[3].mxu0 }
 0x1fe   :  { %v815_v31 = vadd.f32 %v814_v29, %v306_v22 }
 0x200   :  { %vm816_vm7 = vcmp.ge.f32.partialorder %v815_v31, 0.0  ;;  %v817_v32 = vmul.f32 0.01, %v815_v31 }
 0x202   :  { %v818_v33 = vsel %vm816_vm7, %v815_v31, %v817_v32 }
 0x203   :  { %820 = vrot.lane.b32.xlu0 %v818_v33, %s1280_s0 }
 0x261   :  { %v314_v34 = vpop.permute.xlu1 %313 }
 0x262   :  { %316 = vst.msk [vmem:[#allocation3] sm:$0xf] %vm56_vm3, %v314_v34 }
 0x269   :  { %v318_v35 = vld [vmem:[#allocation3] sm:$0xf] }
 0x26a   :  { %322 = vrot.lane.b32.xlu1 %v318_v35, %s1282_s15  ;;  %476 = vrot.lane.b32.xlu0 %v318_v35, %s1283_s16 }
 0x275   :  { %v821_v36 = vpop.permute.xlu0 %820 }
 0x276   :  { %823 = vst.msk [vmem:[#allocation3] sm:$0xf] %vm56_vm3, %v821_v36 }
 0x27d   :  { %v825_v37 = vld [vmem:[#allocation3] sm:$0xf] }
 0x27e   :  { %981 = vrot.lane.b32.xlu0 %v825_v37, %s1283_s16  ;;  %828 = vrot.lane.b32.xlu1 %v825_v37, %s1282_s15 }
 0x282   :  { %562 = vperm.xlu0 %1226, %v44_v38   ;;  %556 = vperm.xlu1 %1227, %v43_v39  }
 0x2dc   :  { %v323_v41 = vpop.permute.xlu1 %322  ;;  %v477_v43 = vpop.permute.xlu0 %476 }
 0x2dd   :  { %1156 = vmatpush3.msk.msra.mxu1 %vm69_vm4, %v323_v41 }
 0x2de   :  { %1158 = vmatmul.mubr.msk.f32.vlgmr.msra.gmra.mrb[0].mxu1 %vm65_vm5, %v1092_v40  ;;  %1160 = vmatprep.subr.mxu1 %v1279_v0 }
 0x2df   :  { %1161 = vmatpush3.msk.msra.mxu1 %vm69_vm4, %v318_v35  ;;  %1162 = vmatprep.mubr.msk.f32.mxu1 %vm1281_vm2, %v1279_v0 }
 0x2e0   :  { %1165 = vmatprep.subr.mxu1 %v1279_v0 }
 0x2e6   :  { %1163 = vmatmul.mubr.msk.f32.vlgmr.msra.gmra.mrb[0].mxu1 %vm65_vm5, %v317_v42 }
 0x2e7   :  { %1166 = vmatpush3.msk.msra.mxu1 %vm69_vm4, %v477_v43  ;;  %1167 = vmatprep.mubr.msk.f32.mxu1 %vm1281_vm2, %v1279_v0 }
 0x2e8   :  { %1185 = vmatprep.subr.mxu1 %v1279_v0 }
 0x2ee   :  { %1168 = vmatmul.mubr.msk.f32.vlgmr.msra.gmra.mrb[0].mxu1 %vm65_vm5, %v1097_v44 }
 0x2ef   :  { %1187 = vmatprep.mubr.msk.f32.mxu1 %vm1281_vm2, %v1279_v0 }
 0x2f0   :  { %v829_v46 = vpop.permute.xlu1 %828  ;;  %v982_v48 = vpop.permute.xlu0 %981 }
 0x2f1   :  { %1186 = vmatpush3.msk.msra.mxu1 %vm69_vm4, %v829_v46 }
 0x2f2   :  { %1188 = vmatmul.mubr.msk.f32.vlgmr.msra.gmra.mrb[2].mxu1 %vm65_vm5, %v1108_v45  ;;  %1190 = vmatprep.subr.mxu1 %v1279_v0 }
 0x2f3   :  { %1191 = vmatpush3.msk.msra.mxu1 %vm69_vm4, %v825_v37  ;;  %1192 = vmatprep.mubr.msk.f32.mxu1 %vm1281_vm2, %v1279_v0 }
 0x2f4   :  { %1195 = vmatprep.subr.mxu1 %v1279_v0 }
 0x2fa   :  { %1193 = vmatmul.mubr.msk.f32.vlgmr.msra.gmra.mrb[2].mxu1 %vm65_vm5, %v824_v47 }
 0x2fb   :  { %1196 = vmatpush3.msk.msra.mxu1 %vm69_vm4, %v982_v48  ;;  %1197 = vmatprep.mubr.msk.f32.mxu1 %vm1281_vm2, %v1279_v0 }
 0x301   :  { %v557_v50 = vpop.permute.xlu1 %556  ;;  %v563_v54 = vpop.permute.xlu0 %562 }
 0x302   :  { %1198 = vmatmul.mubr.msk.f32.vlgmr.msra.gmra.mrb[2].mxu1 %vm65_vm5, %v1113_v49 }
 0x3c1   :  { %v549_v51 = vpop.f32.mrb[0].mxu1 }
 0x3c2   :  { %v559_v52 = vmul.f32 %v557_v50, %v549_v51  ;;  %v1169_v53 = vpop.f32.mrb[1].mxu1 }
 0x3c4   :  { %v565_v55 = vadd.f32 %v563_v54, %v559_v52 }
 0x3c6   :  { %v566_v56 = vadd.f32 %v565_v55, %v1347_v1 }
 0x3c8   :  { %v568_v57 = vmul.f32 0.01, %v566_v56  ;;  %vm567_vm8 = vcmp.ge.f32.partialorder %v566_v56, 0.0 }
 0x3ca   :  { %v569_v58 = vsel %vm567_vm8, %v566_v56, %v568_v57 }
 0x3cb   :  { %571 = vst.msk [vmem:[#allocation7] sm:$0xf] %vm570_vm9, %v569_v58 }
 0x3d5   :  { %v1054_v59 = vpop.f32.mrb[2].mxu1 }
 0x3d6   :  { %v1059_v60 = vmul.f32 %v1054_v59, %v557_v50  ;;  %v1199_v61 = vpop.f32.mrb[3].mxu1 }
 0x3d8   :  { %v1060_v62 = vadd.f32 %v1059_v60, %v563_v54 }
 0x3da   :  { %v1061_v63 = vadd.f32 %v1060_v62, %v1351_v2 }
 0x3dc   :  { %v1063_v0 = vmul.f32 0.01, %v1061_v63  ;;  %vm1062_vm10 = vcmp.ge.f32.partialorder %v1061_v63, 0.0 }
 0x3de   :  { %v1064_v3 = vsel %vm1062_vm10, %v1061_v63, %v1063_v0 }
 0x3df   :  { %1066 = vst.msk [vmem:[#allocation7 + $0x4] sm:$0xf] %vm570_vm9, %v1064_v3 }
 0x3e0   :  { %1261 = shalt.err (!%p1258_p12)
}
 0x3e1   :  { %s1262_s24 = scalar_lea.hbm %s1499_s7, 128 }
 0x3e2   :  { %p1263_p13 = scmp.ne.s32.totalorder %s1499_s7, %s1262_s24  ;;  %p1266_p0 = scmp.lt.u32.totalorder %s1262_s24, %s1499_s7 }
 0x3e4   :  { %p1268_p1 = pnand %p1266_p0, %p1263_p13 }
 0x3e6   :  { %1271 = shalt.err (!%p1268_p1)
}
 0x3e7   :  { %1078 = dma.vmem_to_hbm [thread:$0]  %s1073_s22, 128, %s1499_s7, [#allocation6], %s1277_s11, %s1277_s11, %s1278_s12  }
 0x3e8   :  { %1274 = dma.done.wait [#allocation6], 128  }
 0x3e9   :  { %1275 = vsyncadd [#allocation6], 4294967168 }
 0x3ea   :  { %1082 = vsyncpa [#allocation5], 1 }
 0x3eb   :  { %1083 = vsyncpa [#allocation6], 1 }

</bundles_post_ra>
